<compile_context>
chip_gen: v6e
topology: v6e:2x2x1
jax: 0.10.0
libtpu: 0.0.40
codegen_flags: <defaults>
</compile_context>

<pallas_src>
import math

import jax
import jax.numpy as jnp
from jax.experimental import pallas as pl
from jax.experimental.pallas import tpu as pltpu


def sinusoidal_pos_emb_kernel(t_ref, fp_ref, o_ref):
    # t_ref:  (TB, 1)   timesteps for this batch tile
    # fp_ref: (2, dim)  row 0 = [freqs, freqs], row 1 = [0..., pi/2...]
    # o_ref:  (TB, dim) output tile
    f = fp_ref[0:1, :]                                   # (1, dim) static slice
    p = fp_ref[1:2, :]                                   # (1, dim) static slice
    # sin(t*f)        for the first  half (p = 0)
    # sin(t*f + pi/2) for the second half (= cos(t*f))
    o_ref[...] = jnp.sin(t_ref[...] * f + p).astype(o_ref.dtype)


def _round_up(x, m):
    return ((x + m - 1) // m) * m


def _pick_batch_tile(B, dim, out_bytes=4):
    """Pick the per-step batch tile TB (rows, multiple of 8)."""
    # Target ~2 MiB of output per grid step (~85% of HBM roofline for ~1 MiB+
    # tiles; 0.35 us/step launch overhead stays hidden), clamped to [512, 8192].
    target_rows = (2 * 1024 * 1024) // (out_bytes * dim)
    tb = max(512, min(8192, int(target_rows)))
    # Cap so the double-buffered output (2 * TB * dim * out_bytes) stays well
    # inside v7x's smaller scoped VMEM (~16 MiB budget for the output buffers).
    vmem_rows = (16 * 1024 * 1024) // (2 * out_bytes * dim)
    tb = min(tb, max(8, int(vmem_rows)))
    tb = max(8, (tb // 8) * 8)
    if B <= tb:
        if B >= 2048:
            # Large batch that would otherwise collapse to a single grid step:
            # split in two so both v7x TensorCores get work.
            return _round_up(pl.cdiv(B, 2), 8)
        return _round_up(B, 8)
    return tb  # B > tb  =>  grid >= 2 automatically


def sinusoidal_pos_emb_pallas(t, dim, out_dtype=jnp.float32):
    """t: (B,) array of timesteps. Returns (B, dim) sinusoidal embedding."""
    assert dim % 2 == 0 and dim >= 4, "dim must be even and >= 4"
    B = t.shape[0]
    half = dim // 2

    # Constants hoisted to the wrapper and folded into one (2, dim) input.
    scale = math.log(10000.0) / (half - 1)
    freqs = jnp.exp(-scale * jnp.arange(half, dtype=jnp.float32))      # (half,)
    f_row = jnp.concatenate([freqs, freqs])                            # (dim,)
    p_row = jnp.concatenate([jnp.zeros((half,), jnp.float32),
                             jnp.full((half,), jnp.pi / 2.0, jnp.float32)])
    fp = jnp.stack([f_row, p_row], axis=0)                             # (2, dim)

    t2 = t.astype(jnp.float32).reshape(B, 1)                           # no pad

    TB = _pick_batch_tile(B, dim, out_bytes=jnp.dtype(out_dtype).itemsize)
    grid = pl.cdiv(B, TB)

    out = pl.pallas_call(
        sinusoidal_pos_emb_kernel,
        out_shape=jax.ShapeDtypeStruct((B, dim), out_dtype),
        grid_spec=pltpu.PrefetchScalarGridSpec(
            num_scalar_prefetch=0,
            grid=(grid,),
            in_specs=[
                pl.BlockSpec((TB, 1), lambda i: (i, 0)),     # batch tile of t
                pl.BlockSpec((2, dim), lambda i: (0, 0)),    # constants (resident)
            ],
            out_specs=pl.BlockSpec((TB, dim), lambda i: (i, 0)),
        ),
        compiler_params=pltpu.CompilerParams(
            dimension_semantics=("parallel",)),
    )(t2, fp)
    return out


# ---------------- pure-JAX reference (mirrors the PyTorch forward) ----------
def sinusoidal_pos_emb_ref(t, dim):
    half = dim // 2
    scale = math.log(10000.0) / (half - 1)
    freqs = jnp.exp(jnp.arange(half, dtype=jnp.float32) * -scale)
    emb = t.astype(jnp.float32)[:, None] * freqs[None, :]
    return jnp.concatenate([jnp.sin(emb), jnp.cos(emb)], axis=-1)


if __name__ == "__main__":
    B, dim = 8, 32

    key = jax.random.PRNGKey(0)
    # timesteps in a diffusion-like range
    t = jax.random.uniform(key, (B,), dtype=jnp.float32) * 1000.0

    out = sinusoidal_pos_emb_pallas(t, dim)
    out = jax.block_until_ready(out)

    ref = sinusoidal_pos_emb_ref(t, dim)
    assert out.shape == (B, dim), out.shape
    # Tolerance accounts for the cos(x) = sin(x + pi/2) fusion at arguments up
    # to ~1000 (ulp(1000) ~ 6e-5 in f32 argument rounding).
    max_err = float(jnp.max(jnp.abs(out - ref)))
    assert max_err < 2e-3, f"mismatch vs reference: max abs err {max_err}"

    print("KERNEL_OK")
</pallas_src>

<mosaic_0001>
module attributes {stable_mosaic.version = 11 : i64} {
  func.func @sinusoidal_pos_emb_kernel(%arg0: i32, %arg1: memref<8x1xf32, #tpu.memory_space<vmem>>, %arg2: memref<2x32xf32, #tpu.memory_space<vmem>>, %arg3: memref<8x32xf32, #tpu.memory_space<vmem>>) attributes {dimension_semantics = [#tpu.dimension_semantics<parallel>], iteration_bounds = array<i64: 1>, scalar_prefetch = 0 : i64, scratch_operands = 0 : i64, tpu.core_type = #tpu.core_type<tc>, window_params = [{transform_indices = @transform_0, window_bounds = array<i64: 8, 1>}, {pipeline_mode = #tpu.pipeline_mode<synchronous>, transform_indices = @transform_1, window_bounds = array<i64: 2, 32>}, {transform_indices = @transform_2, window_bounds = array<i64: 8, 32>}]} {
    %c0 = arith.constant 0 : index
    %c0_0 = arith.constant 0 : index
    %0 = vector.load %arg2[%c0, %c0_0] : memref<2x32xf32, #tpu.memory_space<vmem>>, vector<1x32xf32>
    %c1 = arith.constant 1 : index
    %c0_1 = arith.constant 0 : index
    %1 = vector.load %arg2[%c1, %c0_1] : memref<2x32xf32, #tpu.memory_space<vmem>>, vector<1x32xf32>
    %c0_2 = arith.constant 0 : index
    %c0_3 = arith.constant 0 : index
    %2 = vector.load %arg1[%c0_2, %c0_3] : memref<8x1xf32, #tpu.memory_space<vmem>>, vector<8x1xf32>
    %3 = vector.broadcast %2 : vector<8x1xf32> to vector<8x32xf32>
    %4 = vector.broadcast %0 : vector<1x32xf32> to vector<8x32xf32>
    %5 = arith.mulf %3, %4 : vector<8x32xf32>
    %6 = vector.broadcast %1 : vector<1x32xf32> to vector<8x32xf32>
    %7 = arith.addf %5, %6 : vector<8x32xf32>
    %8 = math.sin %7 : vector<8x32xf32>
    %c0_4 = arith.constant 0 : index
    %c0_5 = arith.constant 0 : index
    %9 = vector.load %arg3[%c0_4, %c0_5] : memref<8x32xf32, #tpu.memory_space<vmem>>, vector<8x32xf32>
    tpu.vector_store %arg3[%c0_4, %c0_5], %8 {strides = array<i32>} : memref<8x32xf32, #tpu.memory_space<vmem>>, vector<8x32xf32>,
    return
  }
  func.func @transform_0(%arg0: i32) -> (i32, i32) {
    %c0_i32 = arith.constant 0 : i32
    %c0_i32_0 = arith.constant 0 : i32
    return %arg0, %c0_i32 : i32, i32
  }
  func.func @transform_1(%arg0: i32) -> (i32, i32) {
    %c0_i32 = arith.constant 0 : i32
    %c0_i32_0 = arith.constant 0 : i32
    %c0_i32_1 = arith.constant 0 : i32
    return %c0_i32, %c0_i32_0 : i32, i32
  }
  func.func @transform_2(%arg0: i32) -> (i32, i32) {
    %c0_i32 = arith.constant 0 : i32
    %c0_i32_0 = arith.constant 0 : i32
    return %arg0, %c0_i32 : i32, i32
  }
}

</mosaic_0001>

<bundles_post_ra>
// kernel: tpu_custom_call.1
= control target key start
LH: loop header
LB: loop body
LE: loop exit
PB: predicated region body
PF: predicated region fallthrough
CT: control target
= control target key end

     0   :  { %v195_v1 = vmov 0   ;;  %s251_s0 = inlined_call_operand.vmem [shape: f32[8,1], index: 0, kind: input, shape index: {}]   ;;  %s252_s1 = inlined_call_operand.vmem [shape: f32[2,32], index: 1, kind: input, shape index: {}]   ;;  %s253_s2 = inlined_call_operand.hbm [shape: f32[8,32], index: 2, kind: output, shape index: {}]  }
   0x1   :  { %v14_v0 = vld [vmem:[%s251_s0] sm:$0xff]  ;;  %168 = vset.pattern.permute.xlu0 %v195_v1 }
   0x2   :  { %17 = vperm.xlu0 %168, %v14_v0  }
   0x3   :  { %7 = vsyncpa [#allocation3], 0  ;;  %v150_v2 = vld [vmem:[%s252_s1] ss:$0 sm:$0xff]  ;;  %v151_v4 = vld [vmem:[%s252_s1 + $0x1] ss:$0 sm:$0xff] }
   0x4   :  { %v196_v18 = vmov 2102212464   ;;  %v197_v20 = vmov 920167782   ;;  %v198_v24 = vmov 1326507024  }
   0x5   :  { %v199_v26 = vmov 683565275   ;;  %v200_v28 = vmov 2475754826   ;;  %v201_v31 = vmov 2131351028  }
   0x6   :  { %s202_s0 = smov [#allocation2]   ;;  %vm134_vm12 = vcmask 261120  }
   0x7   :  { %s142_s1 = sshll.u32 %s202_s0, 4  ;;  %s143_s1 = int_to_ptr.vmem [resolvable:$true] %s142_s1 }
   0x8   :  { %s173_s15 = scalar_lea.vmem %s143_s1, 128  ;;  %p178_p1 = scmp.lt.s32.totalorder %s143_s1, %s143_s1 }
   0x9   :  { %p174_p0 = scmp.ne.s32.totalorder %s143_s1, %s173_s15  ;;  %p179_p2 = scmp.lt.s32.totalorder %s173_s15, %s173_s15 }
   0xb   :  { %p180_p3 = por %p179_p2, %p178_p1 }
   0xd   :  { %p181_p4 = pnand %p180_p3, %p174_p0 }
  0x7d   :  { %v18_v3 = vpop.permute.xlu0 %17 }
  0x7e   :  { %v24_v5 = vmul.f32 %v150_v2, %v18_v3 }
  0x80   :  { %v227_v6 = vadd.f32 %v151_v4, %v24_v5 }
  0x82   :  { %v33_v7 = vand.u32 2139095040, %v227_v6  ;;  %v30_v8 = vand.u32 2147483647, %v227_v6  ;;  %vm32_vm7 = vcmp.lt.s32.totalorder %v227_v6, 0  ;;  %vm122_vm13 = vweird.f32 %v227_v6 }
  0x84   :  { %v34_v9 = vshrl.u32 %v33_v7, 23  ;;  %v37_v11 = vand.u32 8388607, %v30_v8  ;;  %vm31_vm8 = vcmp.le.f32.partialorder %v30_v8, 0.7853982 }
  0x86   :  { %v152_v10 = vadd.s32 4294967169, %v34_v9  ;;  %v38_v14 = vor.u32 8388608, %v37_v11 }
  0x88   :  { %v40_v12 = vadd.s32 1, %v152_v10  ;;  %v78_v22 = vshll.u32 %v38_v14, 8 }
  0x8a   :  { %vm41_vm0 = vcmp.gt.s32.totalorder %v40_v12, 0 }
  0x8b   :  { %v42_v13 = vsel %vm41_vm0, %v40_v12, 0 }
  0x8c   :  { %v44_v15 = vand.u32 31, %v42_v13  ;;  %v43_v16 = vshrl.u32 %v42_v13, 5 }
  0x8e   :  { %v45_v17 = vsub.s32 32, %v44_v15  ;;  %v56_v19 = vshll.u32 %v196_v18, %v44_v15  ;;  %v59_v21 = vshll.u32 %v197_v20, %v44_v15  ;;  %v47_v27 = vshll.u32 %v199_v26, %v44_v15 }
  0x8f   :  { %v50_v30 = vshll.u32 %v200_v28, %v44_v15  ;;  %v53_v33 = vshll.u32 %v201_v31, %v44_v15  ;;  %vm65_vm1 = vcmp.lt.s32.totalorder %v43_v16, 4  ;;  %vm62_vm2 = vcmp.lt.s32.totalorder %v43_v16, 1 }
  0x90   :  { %v57_v23 = vshrl.u32 %v197_v20, %v45_v17  ;;  %v60_v25 = vshrl.u32 %v198_v24, %v45_v17  ;;  %v48_v29 = vshrl.u32 %v200_v28, %v45_v17  ;;  %v51_v32 = vshrl.u32 %v201_v31, %v45_v17 }
  0x91   :  { %v54_v34 = vshrl.u32 %v196_v18, %v45_v17  ;;  %v46_v38 = vshrl.u32 %v199_v26, %v45_v17  ;;  %vm63_vm3 = vcmp.lt.s32.totalorder %v43_v16, 2  ;;  %vm64_vm4 = vcmp.lt.s32.totalorder %v43_v16, 3 }
  0x92   :  { %v58_v35 = vor.u32 %v57_v23, %v56_v19  ;;  %v61_v36 = vor.u32 %v60_v25, %v59_v21  ;;  %v49_v37 = vor.u32 %v48_v29, %v47_v27  ;;  %v52_v39 = vor.u32 %v51_v32, %v50_v30 }
  0x93   :  { %v55_v40 = vor.u32 %v54_v34, %v53_v33 }
  0x94   :  { %v71_v41 = vsel %vm65_vm1, %v58_v35, 920167782  ;;  %v75_v42 = vsel %vm65_vm1, %v61_v36, 1326507024  ;;  %v70_v44 = vsel %vm62_vm2, %v49_v37, %v52_v39  ;;  %v66_v47 = vsel %vm62_vm2, %v46_v38, %v49_v37 }
  0x95   :  { %v67_v43 = vsel %vm65_vm1, %v55_v40, 2102212464  ;;  %v72_v45 = vsel %vm64_vm4, %v55_v40, %v71_v41  ;;  %v74_v46 = vsel %vm62_vm2, %v52_v39, %v55_v40  ;;  %v76_v50 = vsel %vm64_vm4, %v58_v35, %v75_v42 }
  0x96   :  { %v68_v48 = vsel %vm64_vm4, %v52_v39, %v67_v43  ;;  %v73_v49 = vsel %vm63_vm3, %v70_v44, %v72_v45  ;;  %v77_v51 = vsel %vm63_vm3, %v74_v46, %v76_v50 }
  0x97   :  { %v233_v52 = vmul.u32.u64.low %v78_v22, %v73_v49  ;;  %v234_v53 = vmul.u32.u64.high %v78_v22, %v73_v49, %v233_v52  ;;  %v236_v54 = vmul.u32.u64.low %v78_v22, %v77_v51  ;;  %v237_v55 = vmul.u32.u64.high %v78_v22, %v77_v51, %v236_v54 }
  0x98   :  { %v69_v56 = vsel %vm63_vm3, %v66_v47, %v68_v48 }
  0x99   :  { %v88_v57 = vadd.s32 1, %v234_v53  ;;  %v85_v58 = vmul.u32 %v78_v22, %v69_v56  ;;  %vm87_vm5 = vc.u32 %v237_v55, %v233_v52  ;;  %v86_v7 = vadd.s32 %v233_v52, %v237_v55 }
  0x9b   :  { %v89_v59 = vsel %vm87_vm5, %v88_v57, %v234_v53 }
  0x9c   :  { %v90_v60 = vadd.s32 %v89_v59, %v85_v58 }
  0x9e   :  { %v91_v61 = vadd.s32 536870912, %v90_v60 }
  0xa0   :  { %v92_v62 = vshrl.u32 %v91_v61, 30 }
  0xa2   :  { %v93_v63 = vshll.u32 %v92_v62, 30  ;;  %v116_v21 = vsub.s32 4, %v92_v62 }
  0xa4   :  { %v94_v0 = vsub.s32 %v90_v60, %v93_v63  ;;  %v117_v24 = vsel %vm32_vm7, %v116_v21, %v92_v62 }
  0xa5   :  { %v119_v25 = vsel %vm31_vm8, 0, %v117_v24 }
  0xa6   :  { %v96_v1 = vsub.s32 0, %v94_v0  ;;  %v123_v26 = vadd.s32 3, %v119_v25 }
  0xa8   :  { %v153_v2 = vmin.u32 %v96_v1, %v94_v0  ;;  %v124_v27 = vand.u32 3, %v123_v26 }
  0xaa   :  { %v98_v3 = vclz %v153_v2  ;;  %vm129_vm9 = vcmp.eq.s32.totalorder %v124_v27, 2  ;;  %vm126_vm10 = vcmp.eq.s32.totalorder %v124_v27, 0  ;;  %vm125_vm11 = vcmp.lt.s32.totalorder %v124_v27, 2 }
  0xac   :  { %v154_v4 = vadd.s32 4294967294, %v98_v3 }
  0xae   :  { %vm155_vm6 = vcmp.lt.s32.totalorder %v154_v4, 0 }
  0xaf   :  { %v101_v5 = vsel %vm155_vm6, 0, %v154_v4 }
  0xb0   :  { %v102_v9 = vsub.s32 32, %v101_v5  ;;  %v106_v10 = vsub.s32 4294967266, %v101_v5  ;;  %v103_v11 = vshll.u32 %v94_v0, %v101_v5 }
  0xb2   :  { %v104_v12 = vshrl.u32 %v86_v7, %v102_v9  ;;  %v107_v13 = vadd.s32 127, %v106_v10 }
  0xb4   :  { %v105_v14 = vor.u32 %v104_v12, %v103_v11  ;;  %v108_v15 = vshll.u32 %v107_v13, 23 }
  0xb6   :  { %v109_v16 = vor.u32 4788187, %v108_v15  ;;  %v112_v18 = vcvt.s32.f32 %v105_v14 }
  0xb8   :  { %v110_v17 = vand.u32 2147483647, %v109_v16 }
  0xba   :  { %v113_v19 = vmul.f32 %v112_v18, %v110_v17 }
  0xbc   :  { %v114_v20 = vxor.u32 2147483648, %v113_v19 }
  0xbe   :  { %v115_v22 = vsel %vm32_vm7, %v114_v20, %v113_v19 }
  0xbf   :  { %v118_v23 = vsel %vm31_vm8, %v227_v6, %v115_v22 }
  0xc0   :  { %169 = vcosq.f32 %v118_v23 }
  0xc1   :  { %171 = vsinq.f32 %v118_v23 }
  0xcd   :  { %v170_v28 = vpop.eup %169 }
  0xce   :  { %v172_v29 = vpop.eup %171  ;;  %v130_v30 = vxor.u32 2147483648, %v170_v28 }
  0xcf   :  { %v127_v31 = vxor.u32 2147483648, %v172_v29 }
  0xd0   :  { %v131_v32 = vsel %vm129_vm9, %v130_v30, %v172_v29 }
  0xd1   :  { %v128_v8 = vsel %vm126_vm10, %v170_v28, %v127_v31 }
  0xd2   :  { %v132_v33 = vsel %vm125_vm11, %v128_v8, %v131_v32 }
  0xd3   :  { %v133_v34 = vsel %vm122_vm13, nan, %v132_v33 }
  0xd4   :  { %135 = vst.msk [vmem:[#allocation2] sm:$0xff] %vm134_vm12, %v133_v34 }
  0xd5   :  { %184 = shalt.err (!%p181_p4)
}
  0xd6   :  { %145 = dma.vmem_to_hbm [thread:$0]  %s143_s1, 128, %s253_s2, [#allocation3]  }
  0xd7   :  { %193 = dma.done.wait [#allocation3], 128  }
  0xd8   :  { %194 = vsyncadd [#allocation3], 4294967168 }
  0xd9   :  { %149 = vsyncpa [#allocation3], 1 }

</bundles_post_ra>
